<compile_context>
chip_gen: v7x
topology: tpu7x:2x2x1
jax: 0.10.0
libtpu: 0.0.40
codegen_flags: <defaults>
</compile_context>

<pallas_src>
import jax
import jax.numpy as jnp
from jax.experimental import pallas as pl
from jax.experimental.pallas import tpu as pltpu

_EPS = 1e-5  # nn.LayerNorm default (module's eps=1e-6 constructor arg is ignored upstream)

_VMEM_LIMIT_BYTES = 32 * 1024 * 1024   # explicit scoped-VMEM request (safe on v5e/v6e/v7x)
_VMEM_BLOCK_BUDGET = 26 * 1024 * 1024  # per-block working-set cap (under the 32 MiB limit)
_TARGET_TILE_BYTES = 4 * 1024 * 1024   # ~4 MiB input tile to amortize the ~0.35 us/step cost


def _layernorm_kernel(x_ref, w_ref, b_ref, o_ref):
    # x_ref/o_ref: (1, C, TS)   w_ref/b_ref: (1, C, 1)  (untiled, VMEM resident)
    c = x_ref.shape[1]
    inv_c = 1.0 / c

    # Pass 1: mean over the channel (sublane) axis.
    mean = jnp.sum(x_ref[...].astype(jnp.float32), axis=1, keepdims=True) * inv_c  # (1,1,TS)

    # Pass 2: centered variance (PyTorch's (x - mean)^2 formulation) + normalize.
    xm = x_ref[...].astype(jnp.float32) - mean                                     # (1,C,TS)
    var = jnp.sum(xm * xm, axis=1, keepdims=True) * inv_c                          # (1,1,TS)
    inv = jax.lax.rsqrt(var + _EPS)

    w = w_ref[...].astype(jnp.float32)   # (1,C,1) -> lane-broadcast
    b = b_ref[...].astype(jnp.float32)
    o_ref[...] = (xm * inv * w + b).astype(o_ref.dtype)


def _choose_spatial_tile(hw, c, dtype, batch):
    """Pick the spatial (lane) tile: full extent if it fits the budget, otherwise
    the largest multiple of 128 that keeps the per-block VMEM working set under
    the cap. VMEM accounting uses the sublane-padded channel count."""
    itemsize = jnp.dtype(dtype).itemsize
    sublane = max(8, 32 // itemsize)                 # f32->8, bf16->16, int8/fp8->32
    padded_c = -(-c // sublane) * sublane

    bytes_per_col_in = padded_c * itemsize
    # in + out double-buffered (2x each) + ~1 f32 working tile (xm)
    vmem_per_col = 4 * bytes_per_col_in + 4 * padded_c

    max_cols_target = _TARGET_TILE_BYTES // bytes_per_col_in
    max_cols_vmem = _VMEM_BLOCK_BUDGET // vmem_per_col
    max_ts = max(128, (min(max_cols_target, max_cols_vmem) // 128) * 128)

    ts = hw if hw <= max_ts else max_ts              # full extent or multiple of 128

    # v7x megacore: make sure the (parallel x parallel) grid has >= 2 steps.
    if batch * pl.cdiv(hw, ts) < 2 and hw >= 256:
        half = ((hw + 1) // 2 + 127) // 128 * 128
        if half < hw:
            ts = half
    return ts


@jax.jit
def layer_normalization(x, weight, bias):
    """Equivalent of LayerNormalization.forward for NCHW input x: (B, C, H, W)."""
    bsz, c, h, w = x.shape
    hw = h * w
    x3 = x.reshape(bsz, c, hw)           # native layout, no transpose
    w3 = weight.reshape(1, c, 1)
    b3 = bias.reshape(1, c, 1)

    ts = _choose_spatial_tile(hw, c, x.dtype, bsz)
    grid = (bsz, pl.cdiv(hw, ts))

    y3 = pl.pallas_call(
        _layernorm_kernel,
        out_shape=jax.ShapeDtypeStruct((bsz, c, hw), x.dtype),
        grid_spec=pltpu.PrefetchScalarGridSpec(
            num_scalar_prefetch=0,
            grid=grid,
            in_specs=[
                pl.BlockSpec((1, c, ts), lambda i, j: (i, 0, j)),
                # weight/bias: whole-array, one-time copy into VMEM, out of the pipeline
                pl.BlockSpec(memory_space=pltpu.MemorySpace.VMEM),
                pl.BlockSpec(memory_space=pltpu.MemorySpace.VMEM),
            ],
            out_specs=pl.BlockSpec((1, c, ts), lambda i, j: (i, 0, j)),
        ),
        compiler_params=pltpu.CompilerParams(
            dimension_semantics=("parallel", "parallel"),
            vmem_limit_bytes=_VMEM_LIMIT_BYTES),
    )(x3, w3, b3)

    return y3.reshape(bsz, c, h, w)


if __name__ == "__main__":
    key = jax.random.PRNGKey(0)
    kx, kw, kb = jax.random.split(key, 3)

    B, C, H, W = 2, 4, 16, 16          # features = C = 4
    x = jax.random.normal(kx, (B, C, H, W), dtype=jnp.float32)
    # nn.LayerNorm init is weight=1, bias=0; use deterministic random values
    # to exercise the affine transform as well.
    weight = 1.0 + 0.1 * jax.random.normal(kw, (C,), dtype=jnp.float32)
    bias = 0.1 * jax.random.normal(kb, (C,), dtype=jnp.float32)

    out = layer_normalization(x, weight, bias)
    out = jax.block_until_ready(out)

    # Pure-JAX reference: normalize over the channel axis per spatial location
    # (identical to reshape/transpose + nn.LayerNorm(C) + transpose back).
    mean = jnp.mean(x, axis=1, keepdims=True)
    var = jnp.mean((x - mean) ** 2, axis=1, keepdims=True)
    ref = (x - mean) / jnp.sqrt(var + _EPS) * weight[None, :, None, None] \
          + bias[None, :, None, None]
    assert out.shape == x.shape
    assert jnp.allclose(out, ref, atol=1e-5, rtol=1e-5), "mismatch vs reference"

    print("KERNEL_OK")
</pallas_src>

<mosaic_0001>
module attributes {stable_mosaic.version = 11 : i64} {
  func.func @_layernorm_kernel(%arg0: i32, %arg1: i32, %arg2: memref<1x4x256xf32, #tpu.memory_space<vmem>>, %arg3: memref<1x4x1xf32, #tpu.memory_space<vmem>>, %arg4: memref<1x4x1xf32, #tpu.memory_space<vmem>>, %arg5: memref<1x4x256xf32, #tpu.memory_space<vmem>>) attributes {dimension_semantics = [#tpu.dimension_semantics<parallel>, #tpu.dimension_semantics<parallel>], iteration_bounds = array<i64: 2, 1>, scalar_prefetch = 0 : i64, scratch_operands = 0 : i64, tpu.core_type = #tpu.core_type<tc>, window_params = [{transform_indices = @transform_0, window_bounds = array<i64: 1, 4, 256>}, {pipeline_mode = #tpu.pipeline_mode<synchronous>, transform_indices = @transform_1, window_bounds = array<i64: 1, 4, 1>}, {pipeline_mode = #tpu.pipeline_mode<synchronous>, transform_indices = @transform_2, window_bounds = array<i64: 1, 4, 1>}, {transform_indices = @transform_3, window_bounds = array<i64: 1, 4, 256>}]} {
    %c0 = arith.constant 0 : index
    %c0_0 = arith.constant 0 : index
    %c0_1 = arith.constant 0 : index
    %0 = vector.load %arg2[%c0, %c0_0, %c0_1] : memref<1x4x256xf32, #tpu.memory_space<vmem>>, vector<1x4x256xf32>
    %cst = arith.constant dense<0.000000e+00> : vector<1x256xf32>
    %1 = vector.multi_reduction <add>, %0, %cst [1] : vector<1x4x256xf32> to vector<1x256xf32>
    %2 = vector.shape_cast %1 : vector<1x256xf32> to vector<1x1x256xf32>
    %cst_2 = arith.constant 2.500000e-01 : f32
    %3 = vector.broadcast %cst_2 : f32 to vector<1x1x256xf32>
    %4 = arith.mulf %2, %3 : vector<1x1x256xf32>
    %c0_3 = arith.constant 0 : index
    %c0_4 = arith.constant 0 : index
    %c0_5 = arith.constant 0 : index
    %5 = vector.load %arg2[%c0_3, %c0_4, %c0_5] : memref<1x4x256xf32, #tpu.memory_space<vmem>>, vector<1x4x256xf32>
    %6 = vector.broadcast %4 : vector<1x1x256xf32> to vector<1x4x256xf32>
    %7 = arith.subf %5, %6 : vector<1x4x256xf32>
    %8 = arith.mulf %7, %7 : vector<1x4x256xf32>
    %cst_6 = arith.constant dense<0.000000e+00> : vector<1x256xf32>
    %9 = vector.multi_reduction <add>, %8, %cst_6 [1] : vector<1x4x256xf32> to vector<1x256xf32>
    %10 = vector.shape_cast %9 : vector<1x256xf32> to vector<1x1x256xf32>
    %cst_7 = arith.constant 2.500000e-01 : f32
    %11 = vector.broadcast %cst_7 : f32 to vector<1x1x256xf32>
    %12 = arith.mulf %10, %11 : vector<1x1x256xf32>
    %cst_8 = arith.constant 9.99999974E-6 : f32
    %13 = vector.broadcast %cst_8 : f32 to vector<1x1x256xf32>
    %14 = arith.addf %12, %13 : vector<1x1x256xf32>
    %15 = math.rsqrt %14 : vector<1x1x256xf32>
    %c0_9 = arith.constant 0 : index
    %c0_10 = arith.constant 0 : index
    %c0_11 = arith.constant 0 : index
    %16 = vector.load %arg3[%c0_9, %c0_10, %c0_11] : memref<1x4x1xf32, #tpu.memory_space<vmem>>, vector<1x4x1xf32>
    %c0_12 = arith.constant 0 : index
    %c0_13 = arith.constant 0 : index
    %c0_14 = arith.constant 0 : index
    %17 = vector.load %arg4[%c0_12, %c0_13, %c0_14] : memref<1x4x1xf32, #tpu.memory_space<vmem>>, vector<1x4x1xf32>
    %18 = vector.broadcast %15 : vector<1x1x256xf32> to vector<1x4x256xf32>
    %19 = arith.mulf %7, %18 : vector<1x4x256xf32>
    %20 = vector.broadcast %16 : vector<1x4x1xf32> to vector<1x4x256xf32>
    %21 = arith.mulf %19, %20 : vector<1x4x256xf32>
    %22 = vector.broadcast %17 : vector<1x4x1xf32> to vector<1x4x256xf32>
    %23 = arith.addf %21, %22 : vector<1x4x256xf32>
    %c0_15 = arith.constant 0 : index
    %c0_16 = arith.constant 0 : index
    %c0_17 = arith.constant 0 : index
    %24 = vector.load %arg5[%c0_15, %c0_16, %c0_17] : memref<1x4x256xf32, #tpu.memory_space<vmem>>, vector<1x4x256xf32>
    tpu.vector_store %arg5[%c0_15, %c0_16, %c0_17], %23 {strides = array<i32>} : memref<1x4x256xf32, #tpu.memory_space<vmem>>, vector<1x4x256xf32>,
    return
  }
  func.func @transform_0(%arg0: i32, %arg1: i32) -> (i32, i32, i32) {
    %c0_i32 = arith.constant 0 : i32
    %c0_i32_0 = arith.constant 0 : i32
    return %arg0, %c0_i32, %arg1 : i32, i32, i32
  }
  func.func @transform_1(%arg0: i32, %arg1: i32) -> (i32, i32, i32) {
    %c0_i32 = arith.constant 0 : i32
    %c0_i32_0 = arith.constant 0 : i32
    %c0_i32_1 = arith.constant 0 : i32
    %c0_i32_2 = arith.constant 0 : i32
    return %c0_i32, %c0_i32_0, %c0_i32_1 : i32, i32, i32
  }
  func.func @transform_2(%arg0: i32, %arg1: i32) -> (i32, i32, i32) {
    %c0_i32 = arith.constant 0 : i32
    %c0_i32_0 = arith.constant 0 : i32
    %c0_i32_1 = arith.constant 0 : i32
    %c0_i32_2 = arith.constant 0 : i32
    return %c0_i32, %c0_i32_0, %c0_i32_1 : i32, i32, i32
  }
  func.func @transform_3(%arg0: i32, %arg1: i32) -> (i32, i32, i32) {
    %c0_i32 = arith.constant 0 : i32
    %c0_i32_0 = arith.constant 0 : i32
    return %arg0, %c0_i32, %arg1 : i32, i32, i32
  }
}

</mosaic_0001>

<bundles_post_ra>
// kernel: layer_normalization.1
= control target key start
LH: loop header
LB: loop body
LE: loop exit
PB: predicated region body
PF: predicated region fallthrough
CT: control target
= control target key end

     0   :  { %s472_s12 = smov 0   ;;  %s474_s13 = smov 0   ;;  %s522_s0 = inlined_call_operand.vmem [shape: f32[2,4,256], index: 0, kind: input, shape index: {}]   ;;  %s523_s1 = inlined_call_operand.vmem [shape: f32[1,4,1], index: 1, kind: input, shape index: {}]   ;;  %s524_s2 = inlined_call_operand.vmem [shape: f32[1,4,1], index: 2, kind: input, shape index: {}]   ;;  %s525_s3 = inlined_call_operand.vmem [shape: f32[2,4,256], index: 3, kind: output, shape index: {}]  }
   0x1   :  { %s476_s14 = smov 0  }
   0x2 LB: > { %s25_s15 = sadd.s32 1, %s444_s13  ;;  %p385_p0 = scmp.ge.s32.totalorder %s448_s14, 1  ;;  %s448_s14 = sphi %s476_s14, %s13_s14   ;;  %s444_s13 = sphi %s474_s13, %s527_s13   ;;  %s440_s12 = sphi %s472_s12, %s526_s12  }
   0x3   : > { %p27_p1 = scmp.ge.s32.totalorder %s25_s15, 2  ;;  %p158_p2 = scmp.lt.s32.totalorder %s448_s14, 3 }
   0x5   : > { %s529_s15 = smov (%p27_p1, %s25_s15), 0  ;;  %p159_p3 = pnand %p385_p0, %p158_p2 }
   0x6   : > { %v260_v0 = vld [vmem:[%s523_s1] sm:$0xf] (!%p159_p3)  ;;  %v450_v1 = vmov (!%p159_p3), 0   ;;  %p191_p4 = scmp.lt.s32.totalorder (!%p159_p3), %s440_s12, 1  ;;  %vm214_vm0 = vcmask (!%p159_p3), 1043456   ;;  %v274_v45 = vlaneseq (!%p159_p3) }
   0x7   : > { %162 = sbr.rel (%p159_p3) target bundleno = 145 (0x91), region = 32  ;;  %420 = vset.pattern.permute.xlu0 (!%p159_p3), %v450_v1  ;;  %v261_v2 = vld [vmem:[%s524_s2] sm:$0xf] (!%p159_p3)  ;;  %v451_v43 = vmov (!%p159_p3), 839922192  }
   0x8   : > { %269 = vperm.xlu0 (!%p159_p3), %420, %v260_v0   ;;  %v272_v44 = vunpack.c.l.s4 (!%p159_p3), %v451_v43  ;;  %v275_v48 = vshrl.u32 (!%p159_p3), %v274_v45, 7 }
   0xa   : > { %v273_v47 = vunpack.c.0.s8 (!%p159_p3), %v272_v44 }
   0xc   : > { %282 = vperm.xlu0 (!%p159_p3), %420, %v261_v2   ;;  %v276_v50 = vsub.s32 (!%p159_p3), %v273_v47, %v275_v48 }
   0xe   : > { %s531_s12 = smov (!%p191_p4, %s440_s12), 1 }
   0xf   : > { %s392_s20 = sshll.u32 %s531_s12, 3 }
  0x10   : > { %s198_s23 = scalar_lea.vmem %s522_s0, %s392_s20  ;;  %s208_s26 = scalar_lea.vmem %s525_s3, %s392_s20 }
  0x11   : > { %v210_v3 = vld [vmem:[%s198_s23] sm:$0xff] }
  0x12   : > { %v212_v4 = vcombine.high %v210_v3, %v210_v3  ;;  %v215_v5 = vsel %vm214_vm0, %v210_v3, 0.0 }
  0x13   : > { %v216_v7 = vrot.slane %v215_v5, 4 }
  0x14   : > { %v222_v6 = vsel %vm214_vm0, %v212_v4, 0.0 }
  0x15   : > { %v223_v8 = vrot.slane %v222_v6, 4  ;;  %v217_v9 = vadd.f32 %v216_v7, %v215_v5 }
  0x17   : > { %v224_v10 = vadd.f32 %v223_v8, %v222_v6  ;;  %v218_v11 = vrot.slane %v217_v9, 2 }
  0x19   : > { %v225_v12 = vrot.slane %v224_v10, 2  ;;  %v219_v13 = vadd.f32 %v218_v11, %v217_v9 }
  0x1b   : > { %v226_v14 = vadd.f32 %v225_v12, %v224_v10  ;;  %v220_v15 = vrot.slane %v219_v13, 1 }
  0x1d   : > { %v227_v16 = vrot.slane %v226_v14, 1  ;;  %v221_v17 = vadd.f32 %v220_v15, %v219_v13 }
  0x1f   : > { %v228_v18 = vadd.f32 %v227_v16, %v226_v14  ;;  %v229_v19 = vmul.f32 0.25, %v221_v17 }
  0x21   : > { %v230_v20 = vmul.f32 0.25, %v228_v18 }
  0x23   : > { %v233_v21 = vcombine.low %v229_v19, %v230_v20 }
  0x25   : > { %v235_v22 = vsub.f32 %v210_v3, %v233_v21 }
  0x27   : > { %v236_v23 = vmul.f32 %v235_v22, %v235_v22 }
  0x29   : > { %v238_v24 = vcombine.high %v236_v23, %v236_v23  ;;  %v240_v25 = vsel %vm214_vm0, %v236_v23, 0.0 }
  0x2a   : > { %v241_v27 = vrot.slane %v240_v25, 4 }
  0x2b   : > { %v247_v26 = vsel %vm214_vm0, %v238_v24, 0.0 }
  0x2c   : > { %v248_v28 = vrot.slane %v247_v26, 4  ;;  %v242_v29 = vadd.f32 %v241_v27, %v240_v25 }
  0x2e   : > { %v249_v30 = vadd.f32 %v248_v28, %v247_v26  ;;  %v243_v31 = vrot.slane %v242_v29, 2 }
  0x30   : > { %v250_v32 = vrot.slane %v249_v30, 2  ;;  %v244_v33 = vadd.f32 %v243_v31, %v242_v29 }
  0x32   : > { %v251_v34 = vadd.f32 %v250_v32, %v249_v30  ;;  %v245_v35 = vrot.slane %v244_v33, 1 }
  0x34   : > { %v252_v36 = vrot.slane %v251_v34, 1  ;;  %v246_v37 = vadd.f32 %v245_v35, %v244_v33 }
  0x36   : > { %v253_v38 = vadd.f32 %v252_v36, %v251_v34  ;;  %v254_v39 = vmul.f32 0.25, %v246_v37 }
  0x38   : > { %v255_v40 = vmul.f32 0.25, %v253_v38  ;;  %v256_v41 = vadd.f32 1e-05, %v254_v39 }
  0x3a   : > { %v257_v42 = vadd.f32 1e-05, %v255_v40  ;;  %422 = vrsqrt.f32 %v256_v41 }
  0x3c   : > { %424 = vrsqrt.f32 %v257_v42 }
  0x44   : > { %v423_v46 = vpop.eup %422 }
  0x46   : > { %v425_v49 = vpop.eup %424 }
  0x47   : > { %v264_v51 = vcombine.low %v423_v46, %v425_v49 }
  0x49   : > { %v266_v53 = vmul.f32 %v264_v51, %v235_v22 }
  0x87   : > { %v270_v52 = vpop.permute.xlu0 %269 }
  0x88   : > { %v277_v54 = vrot.slane %v270_v52, %v276_v50 }
  0x8a   : > { %v279_v56 = vmul.f32 %v277_v54, %v266_v53 }
  0x8b   : > { %v283_v55 = vpop.permute.xlu0 %282 }
  0x8c   : > { %v290_v57 = vrot.slane %v283_v55, %v276_v50 }
  0x8e   : > { %v292_v58 = vadd.f32 %v290_v57, %v279_v56 }
  0x90   : > { %293 = vst [vmem:[%s208_s26] sm:$0xff] %v292_v58 }
  0x91 PF: > { %s13_s14 = sadd.s32 1, %s448_s14   ;;  %s526_s12 = smov %s444_s13 }
  0x92   : > { %p10_p5 = scmp.ge.s32.totalorder %s13_s14, 4   ;;  %s527_s13 = smov %s529_s15 }
  0x94   :  { %12 = sbr.rel (!%p10_p5) target bundleno = 2 (0x2), region = 62 }

</bundles_post_ra>
